<compile_context>
chip_gen: v6e
topology: v6e:2x2x1
jax: 0.10.0
libtpu: 0.0.40
codegen_flags: <defaults>
</compile_context>

<pallas_src>
import functools

import jax
import jax.numpy as jnp
from jax.experimental import pallas as pl
from jax.experimental.pallas import tpu as pltpu

KERNEL_SIZES = (3, 4, 5)
NUM_TAPS = KERNEL_SIZES[-1]          # 5
_NEG = -1e30                         # large finite negative (bf16/f32 safe)


def _round_up(x, m):
    return (x + m - 1) // m * m


def _conv_sent_encoder_kernel(emb_ref, w_ref, mask_ref, b_ref, out_ref, max_sc,
                              *, RC, nc, D, Hp3):
    # emb_ref : (TB, L_store, D)   bf16  -- TB sentences, zero-padded along time
    # w_ref   : (5*D, Hp3)         bf16  -- im2col-fused conv weights (k=3,4,5 bands)
    # mask_ref: (R, Hp3)           f32   -- 0 where (t, band) is a valid conv output,
    #                                       -1e30 otherwise (incl. lane padding)
    # b_ref   : (1, Hp3)           f32   -- fused biases
    # out_ref : (TB, Hp3)          f32   -- max-over-time features, lane dense
    # max_sc  : (TB, Hp3)          f32   -- running max-over-time scratch
    TB = out_ref.shape[0]
    max_sc[...] = jnp.full_like(max_sc, _NEG)

    def process_chunk(start):
        # im2col: the 5 shifted (TB, RC, D) windows concatenated along features, so
        # all taps accumulate inside ONE K = 5*D MXU contraction (f32 accumulator).
        x = jnp.concatenate(
            [emb_ref[:, pl.ds(start + j, RC), :] for j in range(NUM_TAPS)],
            axis=-1).reshape(TB * RC, NUM_TAPS * D)
        y = jnp.dot(x, w_ref[...], preferred_element_type=jnp.float32)
        # Additive validity mask, then fold this chunk into the running max.
        y = y.reshape(TB, RC, Hp3) + mask_ref[pl.ds(start, RC), :][None]
        max_sc[...] = jnp.maximum(max_sc[...], jnp.max(y, axis=1))

    if nc == 1:
        process_chunk(0)
    else:
        @pl.loop(0, nc)
        def _(c):
            process_chunk(pl.multiple_of(c * RC, RC))

    # Bias + ReLU hoisted past the max (bias is t-invariant, ReLU is monotone).
    out_ref[...] = jnp.maximum(max_sc[...] + b_ref[...], 0.0).astype(out_ref.dtype)


def conv_sent_encoder(tokens, emb_table, weights, biases, *, block_b=32):
    """Forward pass of ConvSentEncoder (eval mode).

    tokens    : [B, L] int32 token ids (id 0 = padding)
    emb_table : [vocab, D] float32
    weights   : list of [k, D, H] float32 for k in (3, 4, 5)
                (== torch Conv1d weight [H, D, k] transposed to [k, D, H])
    biases    : list of [H] float32
    returns   : [B, 3H] float32
    """
    B, L = tokens.shape
    D = emb_table.shape[1]
    H = biases[0].shape[0]
    assert L >= max(KERNEL_SIZES), "sentence length must be >= largest conv kernel (5)"

    # Time-chunking: RC rows of conv output per in-kernel step; R padded to nc*RC.
    R0 = L - 2                                   # conv outputs needed for the k=3 band
    RC = min(32, _round_up(R0, 8))
    R = _round_up(R0, RC)
    nc = R // RC
    L_store = R + NUM_TAPS - 1                   # padded time so every tap window fits
    Hp3 = _round_up(3 * H, 128)                  # lane-dense fused output width
    KD = NUM_TAPS * D                            # im2col contraction depth

    # ---- generation-aware VMEM budget --------------------------------------
    try:
        vmem_cap = int(getattr(pltpu.get_tpu_info(), "vmem_capacity_bytes", 64 << 20))
    except Exception:  # pragma: no cover - conservative fallback (e.g. interpret mode)
        vmem_cap = 64 << 20
    vmem_budget = max(vmem_cap - (12 << 20), 16 << 20)

    def _vmem_est(tb):
        return (2 * tb * L_store * D * 2          # double-buffered bf16 emb tiles
                + 2 * KD * Hp3 * 2                # fused im2col weights
                + 2 * R * Hp3 * 4                 # resident additive mask
                + 2 * Hp3 * 4                     # bias
                + 2 * tb * Hp3 * 4                # output tiles
                + tb * Hp3 * 4                    # running-max scratch
                + 3 * tb * RC * KD * 2            # im2col operand + shifted-window copies
                + 2 * tb * RC * Hp3 * 4)          # f32 matmul result / masked tensor

    # ---- batch tile selection ----------------------------------------------
    B8 = _round_up(B, 8)
    TB = _round_up(min(block_b, B8), 8)
    # Keep both TensorCores busy (v7x) / allow megacore sharding: >= 2 grid steps.
    if B8 >= 16 and B8 // TB < 2:
        TB = _round_up(-(-B8 // 2), 8)
    # Shrink the batch tile until the working set fits this generation's VMEM.
    while TB > 8 and _vmem_est(TB) > vmem_budget:
        TB -= 8
    B_pad = _round_up(B, TB)
    grid = (B_pad // TB,)

    # ---- operand preparation -----------------------------------------------
    # Embedding gather (token id 0 -> table row 0, exactly as nn.Embedding); bf16
    # halves HBM traffic of the dominant [B, L, D] operand. Dropout: eval -> identity.
    # TODO(synk): fuse the embedding gather into the kernel (scalar-prefetched token
    # ids + in-kernel DMA gather) to avoid materializing [B, L, D] in HBM at all.
    emb = emb_table[tokens].astype(jnp.bfloat16)                     # [B, L, D]
    emb = jnp.pad(emb, ((0, B_pad - B), (0, L_store - L), (0, 0)))   # zero pad

    # Fuse the three conv weight/bias sets tap-major, then flatten for im2col.
    w_all = jnp.zeros((NUM_TAPS, D, Hp3), jnp.float32)
    b_all = jnp.zeros((1, Hp3), jnp.float32)
    for i, (k, w, b) in enumerate(zip(KERNEL_SIZES, weights, biases)):
        w_all = w_all.at[:k, :, i * H:(i + 1) * H].set(w.astype(jnp.float32))
        b_all = b_all.at[0, i * H:(i + 1) * H].set(b.astype(jnp.float32))
    w_fused = w_all.reshape(KD, Hp3).astype(jnp.bfloat16)

    # Additive validity mask: 0 where conv position t is valid for the band of lane c
    # (t <= L - k), -1e30 elsewhere (incl. time padding and lane padding).
    t_idx = jnp.arange(R)[:, None]
    c_idx = jnp.arange(Hp3)[None, :]
    limit = jnp.where(c_idx < H, L - 3,
            jnp.where(c_idx < 2 * H, L - 4,
            jnp.where(c_idx < 3 * H, L - 5, -1)))
    mask = jnp.where(t_idx <= limit, 0.0, _NEG).astype(jnp.float32)   # (R, Hp3)

    kernel = functools.partial(_conv_sent_encoder_kernel, RC=RC, nc=nc, D=D, Hp3=Hp3)

    vmem_limit = int(min(vmem_budget, max(32 << 20, _vmem_est(TB) + (16 << 20))))

    out = pl.pallas_call(
        kernel,
        out_shape=jax.ShapeDtypeStruct((B_pad, Hp3), jnp.float32),
        grid_spec=pltpu.PrefetchScalarGridSpec(
            num_scalar_prefetch=0,
            grid=grid,
            in_specs=[
                pl.BlockSpec((TB, L_store, D), lambda b: (b, 0, 0)),
                pl.BlockSpec((KD, Hp3), lambda b: (0, 0)),
                pl.BlockSpec((R, Hp3), lambda b: (0, 0)),
                pl.BlockSpec((1, Hp3), lambda b: (0, 0)),
            ],
            out_specs=pl.BlockSpec((TB, Hp3), lambda b: (b, 0)),
            scratch_shapes=[pltpu.VMEM((TB, Hp3), jnp.float32)],
        ),
        compiler_params=pltpu.CompilerParams(
            dimension_semantics=("parallel",),
            vmem_limit_bytes=vmem_limit),
    )(emb, w_fused, mask, b_all)

    return out[:B, :3 * H]


def reference_forward(tokens, emb_table, weights, biases):
    """Pure-JAX f32 reference matching the PyTorch forward (eval mode)."""
    emb = emb_table[tokens]              # [B, L, D]
    L = emb.shape[1]
    outs = []
    for k, (w, b) in zip(KERNEL_SIZES, zip(weights, biases)):
        Lout = L - k + 1
        acc = b[None, None, :]
        for j in range(k):
            acc = acc + jnp.einsum("bld,dh->blh", emb[:, j:j + Lout, :], w[j])
        outs.append(jnp.max(jnp.maximum(acc, 0.0), axis=1))
    return jnp.concatenate(outs, axis=1)


def _build_and_check(key, *, vocab_size, emb_dim, n_hidden, seq_len, batch, block_b):
    k_emb, k_tok, *k_ws = jax.random.split(key, 2 + 2 * len(KERNEL_SIZES))

    emb_table = 0.1 * jax.random.normal(k_emb, (vocab_size, emb_dim), jnp.float32)
    emb_table = emb_table.at[0].set(0.0)           # padding_idx=0 row initialised to zero

    weights, biases = [], []
    for i, k in enumerate(KERNEL_SIZES):
        # Equivalent to PyTorch Conv1d weight [H, D, k] transposed to [k, D, H].
        w = 0.1 * jax.random.normal(k_ws[2 * i], (k, emb_dim, n_hidden), jnp.float32)
        b = 0.1 * jax.random.normal(k_ws[2 * i + 1], (n_hidden,), jnp.float32)
        weights.append(w)
        biases.append(b)

    tokens = jax.random.randint(k_tok, (batch, seq_len), 0, vocab_size, jnp.int32)

    out = conv_sent_encoder(tokens, emb_table, weights, biases, block_b=block_b)
    out = jax.block_until_ready(out)

    ref = reference_forward(tokens, emb_table, weights, biases)
    assert out.shape == (batch, 3 * n_hidden), out.shape
    # bf16 matmul inputs vs f32 reference -> modest tolerance.
    err = float(jnp.max(jnp.abs(out - ref)))
    assert jnp.allclose(out, ref, atol=1e-2, rtol=1e-2), err


if __name__ == "__main__":
    key = jax.random.PRNGKey(0)
    k1, k2 = jax.random.split(key)

    # Small config: multi-step batch grid (12 -> 16 padded, 2 steps), single time chunk.
    _build_and_check(k1, vocab_size=100, emb_dim=32, n_hidden=32,
                     seq_len=16, batch=12, block_b=8)

    # Longer sentences + wider model: exercises the in-kernel time-chunk loop (nc > 1)
    # and a 3-step batch grid.
    _build_and_check(k2, vocab_size=120, emb_dim=64, n_hidden=48,
                     seq_len=40, batch=20, block_b=8)

    print("KERNEL_OK")
</pallas_src>

<mosaic_0001>
module attributes {stable_mosaic.version = 11 : i64} {
  func.func @_conv_sent_encoder_kernel(%arg0: i32, %arg1: memref<8x20x32xbf16, #tpu.memory_space<vmem>>, %arg2: memref<160x128xbf16, #tpu.memory_space<vmem>>, %arg3: memref<16x128xf32, #tpu.memory_space<vmem>>, %arg4: memref<1x128xf32, #tpu.memory_space<vmem>>, %arg5: memref<8x128xf32, #tpu.memory_space<vmem>>, %arg6: memref<8x128xf32, #tpu.memory_space<vmem>>) attributes {dimension_semantics = [#tpu.dimension_semantics<parallel>], iteration_bounds = array<i64: 2>, scalar_prefetch = 0 : i64, scratch_operands = 1 : i64, tpu.core_type = #tpu.core_type<tc>, window_params = [{transform_indices = @transform_0, window_bounds = array<i64: 8, 20, 32>}, {pipeline_mode = #tpu.pipeline_mode<synchronous>, transform_indices = @transform_1, window_bounds = array<i64: 160, 128>}, {pipeline_mode = #tpu.pipeline_mode<synchronous>, transform_indices = @transform_2, window_bounds = array<i64: 16, 128>}, {pipeline_mode = #tpu.pipeline_mode<synchronous>, transform_indices = @transform_3, window_bounds = array<i64: 1, 128>}, {transform_indices = @transform_4, window_bounds = array<i64: 8, 128>}]} {
    %cst = arith.constant -1.000000e+30 : f32
    %0 = vector.broadcast %cst : f32 to vector<8x128xf32>
    %c0 = arith.constant 0 : index
    %c0_0 = arith.constant 0 : index
    %1 = vector.load %arg6[%c0, %c0_0] : memref<8x128xf32, #tpu.memory_space<vmem>>, vector<8x128xf32>
    tpu.vector_store %arg6[%c0, %c0_0], %0 {strides = array<i32>} : memref<8x128xf32, #tpu.memory_space<vmem>>, vector<8x128xf32>,
    %c0_1 = arith.constant 0 : index
    %c0_2 = arith.constant 0 : index
    %c0_3 = arith.constant 0 : index
    %2 = vector.load %arg1[%c0_1, %c0_2, %c0_3] : memref<8x20x32xbf16, #tpu.memory_space<vmem>>, vector<8x16x32xbf16>
    %c0_4 = arith.constant 0 : index
    %c1 = arith.constant 1 : index
    %c0_5 = arith.constant 0 : index
    %3 = vector.load %arg1[%c0_4, %c1, %c0_5] : memref<8x20x32xbf16, #tpu.memory_space<vmem>>, vector<8x16x32xbf16>
    %c0_6 = arith.constant 0 : index
    %c2 = arith.constant 2 : index
    %c0_7 = arith.constant 0 : index
    %4 = vector.load %arg1[%c0_6, %c2, %c0_7] : memref<8x20x32xbf16, #tpu.memory_space<vmem>>, vector<8x16x32xbf16>
    %c0_8 = arith.constant 0 : index
    %c3 = arith.constant 3 : index
    %c0_9 = arith.constant 0 : index
    %5 = vector.load %arg1[%c0_8, %c3, %c0_9] : memref<8x20x32xbf16, #tpu.memory_space<vmem>>, vector<8x16x32xbf16>
    %c0_10 = arith.constant 0 : index
    %c4 = arith.constant 4 : index
    %c0_11 = arith.constant 0 : index
    %6 = vector.load %arg1[%c0_10, %c4, %c0_11] : memref<8x20x32xbf16, #tpu.memory_space<vmem>>, vector<8x16x32xbf16>
    %7 = tpu.concatenate %2, %3, %4, %5, %6 in 2 : vector<8x16x32xbf16>, vector<8x16x32xbf16>, vector<8x16x32xbf16>, vector<8x16x32xbf16>, vector<8x16x32xbf16> -> vector<8x16x160xbf16>
    %8 = vector.shape_cast %7 : vector<8x16x160xbf16> to vector<128x160xbf16>
    %c0_12 = arith.constant 0 : index
    %c0_13 = arith.constant 0 : index
    %9 = vector.load %arg2[%c0_12, %c0_13] : memref<160x128xbf16, #tpu.memory_space<vmem>>, vector<160x128xbf16>
    %cst_14 = arith.constant dense<0.000000e+00> : vector<128x128xf32>
    %10 = tpu.matmul %8, %9, %cst_14 {dimension_numbers = #tpu.dot_dimension_numbers<[1], [0], [0], [1], [0, 0, 1, 1], [], []>} : vector<128x160xbf16>, vector<160x128xbf16>, vector<128x128xf32> -> vector<128x128xf32>
    %11 = vector.shape_cast %10 : vector<128x128xf32> to vector<8x16x128xf32>
    %c0_15 = arith.constant 0 : index
    %c0_16 = arith.constant 0 : index
    %12 = vector.load %arg3[%c0_15, %c0_16] : memref<16x128xf32, #tpu.memory_space<vmem>>, vector<16x128xf32>
    %13 = vector.shape_cast %12 : vector<16x128xf32> to vector<1x16x128xf32>
    %14 = vector.broadcast %13 : vector<1x16x128xf32> to vector<8x16x128xf32>
    %15 = arith.addf %11, %14 : vector<8x16x128xf32>
    %c0_17 = arith.constant 0 : index
    %c0_18 = arith.constant 0 : index
    %16 = vector.load %arg6[%c0_17, %c0_18] : memref<8x128xf32, #tpu.memory_space<vmem>>, vector<8x128xf32>
    %cst_19 = arith.constant dense<0xFF800000> : vector<8x128xf32>
    %17 = vector.multi_reduction <maximumf>, %15, %cst_19 [1] : vector<8x16x128xf32> to vector<8x128xf32>
    %18 = arith.maximumf %16, %17 : vector<8x128xf32>
    %c0_20 = arith.constant 0 : index
    %c0_21 = arith.constant 0 : index
    %19 = vector.load %arg6[%c0_20, %c0_21] : memref<8x128xf32, #tpu.memory_space<vmem>>, vector<8x128xf32>
    tpu.vector_store %arg6[%c0_20, %c0_21], %18 {strides = array<i32>} : memref<8x128xf32, #tpu.memory_space<vmem>>, vector<8x128xf32>,
    %c0_22 = arith.constant 0 : index
    %c0_23 = arith.constant 0 : index
    %20 = vector.load %arg6[%c0_22, %c0_23] : memref<8x128xf32, #tpu.memory_space<vmem>>, vector<8x128xf32>
    %c0_24 = arith.constant 0 : index
    %c0_25 = arith.constant 0 : index
    %21 = vector.load %arg4[%c0_24, %c0_25] : memref<1x128xf32, #tpu.memory_space<vmem>>, vector<1x128xf32>
    %22 = vector.broadcast %21 : vector<1x128xf32> to vector<8x128xf32>
    %23 = arith.addf %20, %22 : vector<8x128xf32>
    %cst_26 = arith.constant 0.000000e+00 : f32
    %24 = vector.broadcast %cst_26 : f32 to vector<8x128xf32>
    %25 = arith.maximumf %23, %24 : vector<8x128xf32>
    %c0_27 = arith.constant 0 : index
    %c0_28 = arith.constant 0 : index
    %26 = vector.load %arg5[%c0_27, %c0_28] : memref<8x128xf32, #tpu.memory_space<vmem>>, vector<8x128xf32>
    tpu.vector_store %arg5[%c0_27, %c0_28], %25 {strides = array<i32>} : memref<8x128xf32, #tpu.memory_space<vmem>>, vector<8x128xf32>,
    return
  }
  func.func @transform_0(%arg0: i32) -> (i32, i32, i32) {
    %c0_i32 = arith.constant 0 : i32
    %c0_i32_0 = arith.constant 0 : i32
    %c0_i32_1 = arith.constant 0 : i32
    return %arg0, %c0_i32, %c0_i32_0 : i32, i32, i32
  }
  func.func @transform_1(%arg0: i32) -> (i32, i32) {
    %c0_i32 = arith.constant 0 : i32
    %c0_i32_0 = arith.constant 0 : i32
    %c0_i32_1 = arith.constant 0 : i32
    return %c0_i32, %c0_i32_0 : i32, i32
  }
  func.func @transform_2(%arg0: i32) -> (i32, i32) {
    %c0_i32 = arith.constant 0 : i32
    %c0_i32_0 = arith.constant 0 : i32
    %c0_i32_1 = arith.constant 0 : i32
    return %c0_i32, %c0_i32_0 : i32, i32
  }
  func.func @transform_3(%arg0: i32) -> (i32, i32) {
    %c0_i32 = arith.constant 0 : i32
    %c0_i32_0 = arith.constant 0 : i32
    %c0_i32_1 = arith.constant 0 : i32
    return %c0_i32, %c0_i32_0 : i32, i32
  }
  func.func @transform_4(%arg0: i32) -> (i32, i32) {
    %c0_i32 = arith.constant 0 : i32
    %c0_i32_0 = arith.constant 0 : i32
    return %arg0, %c0_i32 : i32, i32
  }
}

</mosaic_0001>

<bundles_post_ra>
// kernel: tpu_custom_call.1
= control target key start
LH: loop header
LB: loop body
LE: loop exit
PB: predicated region body
PF: predicated region fallthrough
CT: control target
= control target key end

     0   :  { %9 = vsyncpa [#allocation4], 0  ;;  %s1855_s0 = inlined_call_operand.vmem [shape: bf16[16,20,32], index: 0, kind: input, shape index: {}]   ;;  %s1856_s1 = inlined_call_operand.vmem [shape: bf16[160,128], index: 1, kind: input, shape index: {}]   ;;  %s1857_s2 = inlined_call_operand.vmem [shape: f32[16,128], index: 2, kind: input, shape index: {}]   ;;  %s1858_s3 = inlined_call_operand.vmem [shape: f32[1,128], index: 3, kind: input, shape index: {}]   ;;  %s1859_s4 = inlined_call_operand.hbm [shape: f32[16,128], index: 4, kind: output, shape index: {}]  }
   0x1   :  { %11 = vsyncpa [#allocation4 + $0x1], 0  ;;  %s1439_s15 = smov 0   ;;  %s1441_s16 = smov 0  }
   0x2   :  { %s1443_s17 = smov 0   ;;  %s1445_s18 = smov 0  }
   0x3 LB: > { %s1460_s19 = sadd.s32 4294967295, %s1407_s18   ;;  %s1163_s20 = sadd.s32 4294967294, %s1407_s18   ;;  %s1407_s18 = sphi %s1445_s18, %s1865_s18   ;;  %s1403_s17 = sphi %s1443_s17, %s1864_s17   ;;  %s1399_s16 = sphi %s1441_s16, %s1863_s16   ;;  %s1395_s15 = sphi %s1439_s15, %s1862_s15  }
   0x4   : > { %s1464_s21 = sadd.s32 1, %s1407_s18   ;;  %s113_s22 = sadd.s32 1, %s1403_s17 }
   0x5   : > { %s110_s23 = ssub.s32 %s1407_s18, %s1464_s21  ;;  %p123_p0 = scmp.ne.s32.totalorder %s1403_s17, %s1399_s16 }
   0x6   : > { %p111_p1 = scmp.eq.s32.totalorder %s110_s23, 0  ;;  %p124_p2 = scmp.eq.s32.totalorder %s1460_s19, 1 }
   0x7   : > { %p129_p3 = scmp.ne.s32.totalorder %s1399_s16, %s1395_s15  ;;  %p130_p4 = scmp.eq.s32.totalorder %s1163_s20, 1 }
   0x8   : > { %s1475_s24 = scalar_select %p111_p1, %s1403_s17, %s113_s22  }
   0x9   : > { %p1477_p5 = por %p124_p2, %p123_p0  ;;  %p1481_p6 = por %p130_p4, %p129_p3 }
   0xa   : > { %p1166_p7 = scmp.ge.s32.totalorder %s1407_s18, 1  ;;  %p167_p8 = scmp.lt.s32.totalorder %s1407_s18, 3 }
   0xc   : > { %p168_p9 = pnand %p1166_p7, %p167_p8 }
   0xd   : > { %s1168_s27 = sshll.u32 (!%p168_p9), %s1460_s19, 3  ;;  %s1410_s14 = smov (!%p168_p9), 64  }
   0xe   : > { %171 = sbr.rel (%p168_p9) target bundleno = 429 (0x1ad), region = 36  ;;  %p195_p10 = scmp.lt.s32.totalorder (!%p168_p9), %s1168_s27, 15 }
   0xf   : > { %s1411_s28 = smov (!%p168_p9), 96   ;;  %s1412_s5 = smov (!%p168_p9), 32  }
  0x10   : > { %s191_s22 = sand.u32 (!%p168_p9), 1, %s1399_s16   ;;  %s1230_s29 = sshll.u32 (!%p168_p9), %s1460_s19, 7 }
  0x11   : > { %s1167_s23 = sshll.u32 (!%p168_p9), %s191_s22, 3  ;;  %s1102_s8 = scalar_lea.hbm (!%p168_p9), %s1859_s4, %s1230_s29 }
  0x12   : > { %s193_s30 = scalar_lea.vmem (!%p168_p9), [#allocation3], %s1167_s23  ;;  %s1091_s10 = scalar_lea.sflag (!%p168_p9), [#allocation4], %s191_s22 }
  0x13   : > { %v1409_v0 = vmov 0   ;;  %v1329_v1 = vld [vmem:[%s1856_s1 + $0x38] sm:$0xff]   ;;  %s1867_s27 = smov (!%p195_p10, %s1168_s27), 15  ;;  %v1330_v2 = vld [vmem:[%s1856_s1 + $0x30] sm:$0xff]   ;;  %vm452_vm0 = vcmask 1046528   ;;  %v1331_v3 = vld [vmem:[%s1856_s1 + $0x28] sm:$0xff]  }
  0x14   : > { %882 = vmatprep.subr.bf16.mxu0 %v1409_v0  ;;  %1233 = vmatprep.subr.bf16.mxu1 %v1409_v0  ;;  %s1253_s6 = smul.u32 12, %s1867_s27  ;;  %vm517_vm1 = vsmask.f32 6400  ;;  %v1332_v10 = vld [vmem:[%s1856_s1 + $0x20] sm:$0xff]   ;;  %vm315_vm2 = vsmask.f32 7424 }
  0x15   : > { %883 = vmatpush1.bf16.msra.mxu0 %v1329_v1  ;;  %1243 = vmatpush1.bf16.msra.mxu1 %v1329_v1  ;;  %v1333_v38 = vld [vmem:[%s1856_s1 + $0x18] sm:$0xff]   ;;  %v1334_v57 = vld [vmem:[%s1856_s1 + $0x10] sm:$0xff]   ;;  %vm719_vm3 = vcmask 261120   ;;  %vm694_vm4 = vcmask 1045504   ;;  %vm736_vm5 = vcmask 523264   ;;  %vm753_vm6 = vcmask 785408  }
  0x16   : > { %884 = vmatprep.subr.bf16.mxu0 %v1409_v0  ;;  %1234 = vmatprep.subr.bf16.mxu1 %v1409_v0  ;;  %s1501_s9 = scalar_lea.vmem %s1855_s0, %s1253_s6  ;;  %vm1062_vm7 = vcmask 1041409   ;;  %vm1064_vm8 = vcmask 1042434   ;;  %vm1066_vm9 = vcmask 1043459   ;;  %vm1068_vm10 = vcmask 1044484   ;;  %s1413_s12 = smov [#allocation3]  }
  0x17   : > { %v1507_v4 = vld [vmem:[%s1501_s9 + $0x10] sm:$0xf]  ;;  %v228_v5 = vld [vmem:[%s1501_s9 + $0xc] sm:$0xe]  ;;  %v1517_v8 = vld [vmem:[%s1501_s9 + $0x4] sm:$0xf] }
  0x18   : > { %v1511_v6 = vld [vmem:[%s1501_s9 + $0x14] ss:$0 sps:$4 sm:$0x11]   ;;  %v1514_v7 = vcombine.low %v228_v5, %v1507_v4  ;;  %v227_v9 = vld [vmem:[%s1501_s9] sm:$0xe]  ;;  %vm1070_vm11 = vcmask 1045509  }
  0x19   : > { %885 = vmatpush1.bf16.msra.mxu0 %v1330_v2  ;;  %1244 = vmatpush1.bf16.msra.mxu1 %v1330_v2  ;;  %v457_v12 = vrot.slane %v1511_v6, 1  ;;  %v1299_v13 = vld [vmem:[%s1501_s9 + $0x8] ss:$0 sps:$4 sm:$0x11]   ;;  %v1186_v14 = vcombine.low %v227_v9, %v1517_v8  ;;  %v336_v15 = vshll.u32 %v1511_v6, 16  ;;  %vm1072_vm12 = vcmask 1046534  }
  0x1a   : > { %886 = vmatprep.subr.bf16.mxu0 %v1409_v0  ;;  %1235 = vmatprep.subr.bf16.mxu1 %v1409_v0  ;;  %v456_v11 = vrot.slane %v1514_v7, 1  ;;  %v1531_v16 = vld [vmem:[%s1501_s9 + $0x8] ss:$0 sps:$4 sm:$0x33]   ;;  %v1534_v17 = vld [vmem:[%s1501_s9 + $0x34] sm:$0xf] }
  0x1b   : > { %v536_v18 = vshrl.u32 %v1514_v7, 16  ;;  %v453_v20 = vrot.slane %v1186_v14, 1  ;;  %v454_v21 = vrot.slane %v1299_v13, 1  ;;  %v519_v22 = vshrl.u32 %v1186_v14, 16  ;;  %v231_v26 = vld [vmem:[%s1501_s9 + $0x30] sm:$0xe] }
  0x1c   : > { %v458_v19 = vsel %vm452_vm0, %v456_v11, %v457_v12  ;;  %v522_v23 = vshll.u32 %v1186_v14, 16  ;;  %v527_v24 = vshrl.u32 %v1531_v16, 16  ;;  %v530_v25 = vshll.u32 %v1531_v16, 16  ;;  %v1302_v30 = vld [vmem:[%s1501_s9 + $0x38] ss:$0 sps:$4 sm:$0x11]  }
  0x1d   : > { %887 = vmatpush1.bf16.msra.mxu0 %v1331_v3  ;;  %1245 = vmatpush1.bf16.msra.mxu1 %v1331_v3  ;;  %v324_v27 = vshll.u32 %v1299_v13, 16  ;;  %v455_v28 = vsel %vm452_vm0, %v453_v20, %v454_v21  ;;  %v521_v29 = vrot.slane %v519_v22, 1  ;;  %v1190_v31 = vcombine.low %v231_v26, %v1534_v17  ;;  %v211_v32 = vld [vmem:[%s1501_s9 + $0x30] sm:$0xf]  ;;  %v203_v37 = vld [vmem:[%s1501_s9] sm:$0xf] }
  0x1e   : > { %888 = vmatprep.subr.bf16.mxu0 %v1409_v0  ;;  %1236 = vmatprep.subr.bf16.mxu1 %v1409_v0  ;;  %v524_v33 = vrot.slane %v522_v23, 2  ;;  %v529_v34 = vrot.slane %v527_v24, 1  ;;  %v532_v35 = vrot.slane %v530_v25, 2  ;;  %v1550_v36 = vcombine.low %v211_v32, %v1534_v17  ;;  %v1563_v47 = vld [vmem:[%s1501_s9 + $0x38] ss:$0 sps:$4 sm:$0x33]  }
  0x1f   : > { %479 = vrot.lane.b32.xlu1 %v458_v19, %s1410_s14  ;;  %477 = vrot.lane.b32.xlu0 %v455_v28, %s1410_s14  ;;  %v465_v39 = vrot.slane %v1190_v31, 1  ;;  %v466_v40 = vrot.slane %v1302_v30, 1  ;;  %v372_v41 = vshll.u32 %v1302_v30, 16  ;;  %v1557_v42 = vcombine.low %v203_v37, %v1517_v8  ;;  %v205_v52 = vld [vmem:[%s1501_s9 + $0xc] sm:$0xf] }
  0x20   : > { %v525_v43 = vor.u32 %v524_v33, %v521_v29  ;;  %v533_v44 = vor.u32 %v532_v35, %v529_v34  ;;  %v365_v45 = vshrl.u32 %v1550_v36, 16  ;;  %v367_v46 = vshll.u32 %v1550_v36, 16  ;;  %v213_v62 = vld [vmem:[%s1501_s9 + $0x3c] sm:$0xf]  ;;  %v1590_v13 = vld [vmem:[%s1501_s9 + $0x40] sm:$0xf] }
  0x21   : > { %889 = vmatpush1.bf16.msra.mxu0 %v1332_v10  ;;  %1246 = vmatpush1.bf16.msra.mxu1 %v1332_v10  ;;  %v467_v48 = vsel %vm452_vm0, %v465_v39, %v466_v40  ;;  %v374_v49 = vrot.slane %v372_v41, 1  ;;  %v317_v50 = vshrl.u32 %v1557_v42, 16  ;;  %v319_v51 = vshll.u32 %v1557_v42, 16  ;;  %v1585_v5 = vld [vmem:[%s1501_s9 + $0x14] ss:$0 sps:$4 sm:$0x33]  }
  0x22   : > { %890 = vmatprep.subr.bf16.mxu0 %v1409_v0  ;;  %1237 = vmatprep.subr.bf16.mxu1 %v1409_v0  ;;  %v534_v53 = vsel %vm517_vm1, %v525_v43, %v533_v44  ;;  %v369_v54 = vrot.slane %v367_v46, 1  ;;  %v326_v55 = vrot.slane %v324_v27, 1  ;;  %v587_v56 = vshrl.u32 %v1190_v31, 16  ;;  %v1335_v20 = vld [vmem:[%s1856_s1 + $0x8] sm:$0xff]   ;;  %v232_v26 = vld [vmem:[%s1501_s9 + $0x3c] sm:$0xe] }
  0x23   : > { %485 = vrot.lane.b32.xlu0 %v467_v48, %s1410_s14  ;;  %654 = vrot.lane.b32.xlu1 %v534_v53, %s1411_s28  ;;  %v321_v58 = vrot.slane %v319_v51, 1  ;;  %v590_v59 = vshll.u32 %v1190_v31, 16  ;;  %v595_v60 = vshrl.u32 %v1563_v47, 16  ;;  %v598_v61 = vshll.u32 %v1563_v47, 16  ;;  %v207_v39 = vld [vmem:[%s1501_s9 + $0x18] sm:$0xf] }
  0x24   : > { %v370_v63 = vor.u32 %v369_v54, %v365_v45  ;;  %v589_v1 = vrot.slane %v587_v56, 1  ;;  %v1580_v2 = vcombine.low %v205_v52, %v1507_v4  ;;  %v338_v3 = vrot.slane %v336_v15, 1  ;;  %v1310_v25 = vld [vmem:[%s1501_s9 + $0x44] ss:$0 sps:$4 sm:$0x11]  }
  0x25   : > { %891 = vmatpush1.bf16.msra.mxu0 %v1333_v38  ;;  %1247 = vmatpush1.bf16.msra.mxu1 %v1333_v38  ;;  %v322_v9 = vor.u32 %v321_v58, %v317_v50  ;;  %v592_v10 = vrot.slane %v590_v59, 2  ;;  %v597_v11 = vrot.slane %v595_v60, 1  ;;  %v600_v12 = vrot.slane %v598_v61, 2  ;;  %v1615_v33 = vld [vmem:[%s1501_s9 + $0x44] ss:$0 sps:$4 sm:$0x33]  }
  0x26   : > { %892 = vmatprep.subr.bf16.mxu0 %v1409_v0  ;;  %1238 = vmatprep.subr.bf16.mxu1 %v1409_v0  ;;  %v375_v14 = vsel %vm315_vm2, %v370_v63, %v374_v49  ;;  %v329_v19 = vshrl.u32 %v1580_v2, 16  ;;  %v331_v6 = vshll.u32 %v1580_v2, 16  ;;  %v538_v15 = vrot.slane %v536_v18, 1  ;;  %v1336_v40 = vld [vmem:[%s1856_s1] sm:$0xff]   ;;  %v1626_v46 = vld [vmem:[%s1501_s9 + $0x1c] sm:$0xf] }
  0x27   : > { %420 = vrot.lane.b32.xlu1 %v375_v14, %s1412_s5  ;;  %v327_v21 = vsel %vm315_vm2, %v322_v9, %v326_v55  ;;  %v593_v22 = vor.u32 %v592_v10, %v589_v1  ;;  %v601_v23 = vor.u32 %v600_v12, %v597_v11  ;;  %v539_v24 = vshll.u32 %v1514_v7, 16  ;;  %v229_v52 = vld [vmem:[%s1501_s9 + $0x18] sm:$0xe]  ;;  %v1314_v61 = vld [vmem:[%s1501_s9 + $0x20] ss:$0 sps:$4 sm:$0x11]  }
  0x28   : > { %412 = vrot.lane.b32.xlu0 %v327_v21, %s1412_s5  ;;  %v333_v18 = vrot.slane %v331_v6, 1  ;;  %v544_v27 = vshrl.u32 %v1585_v5, 16  ;;  %v547_v28 = vshll.u32 %v1585_v5, 16  ;;  %v1609_v29 = vcombine.low %v213_v62, %v1590_v13  ;;  %v1337_v62 = vld [vmem:[%s1856_s1 + $0x48] sm:$0xff]  }
  0x29   : > { %893 = vmatpush1.bf16.msra.mxu0 %v1334_v57  ;;  %1248 = vmatpush1.bf16.msra.mxu1 %v1334_v57  ;;  %v602_v30 = vsel %vm517_vm1, %v593_v22, %v601_v23  ;;  %v541_v31 = vrot.slane %v539_v24, 2  ;;  %v384_v7 = vshll.u32 %v1310_v25, 16  ;;  %v1191_v32 = vcombine.low %v232_v26, %v1590_v13  ;;  %v1645_v10 = vld [vmem:[%s1501_s9 + $0x20] ss:$0 sps:$4 sm:$0x33]  }
  0x2a   : > { %894 = vmatprep.subr.bf16.mxu0 %v1409_v0  ;;  %1239 = vmatprep.subr.bf16.mxu1 %v1409_v0  ;;  %v334_v34 = vor.u32 %v333_v18, %v329_v19  ;;  %v546_v35 = vrot.slane %v544_v27, 1  ;;  %v549_v37 = vrot.slane %v547_v28, 2  ;;  %v377_v38 = vshrl.u32 %v1609_v29, 16  ;;  %v215_v11 = vld [vmem:[%s1501_s9 + $0x48] sm:$0xf] }
  0x2b   : > { %662 = vrot.lane.b32.xlu1 %v602_v30, %s1411_s28  ;;  %v542_v41 = vor.u32 %v541_v31, %v538_v15  ;;  %v379_v43 = vshll.u32 %v1609_v29, 16  ;;  %v386_v44 = vrot.slane %v384_v7, 1  ;;  %v468_v45 = vrot.slane %v1191_v32, 1  ;;  %v1653_v15 = vld [vmem:[%s1501_s9 + $0x4c] sm:$0xf] }
  0x2c   : > { %v339_v48 = vsel %vm315_vm2, %v334_v34, %v338_v3  ;;  %v550_v49 = vor.u32 %v549_v37, %v546_v35  ;;  %v469_v50 = vrot.slane %v1310_v25, 1  ;;  %v604_v51 = vshrl.u32 %v1191_v32, 16  ;;  %v1318_v25 = vld [vmem:[%s1501_s9 + $0x50] ss:$0 sps:$4 sm:$0x11]  }
  0x2d   : > { %895 = vmatpush1.bf16.msra.mxu0 %v1335_v20  ;;  %1249 = vmatpush1.bf16.msra.mxu1 %v1335_v20  ;;  %v381_v53 = vrot.slane %v379_v43, 1  ;;  %v607_v54 = vshll.u32 %v1191_v32, 16  ;;  %v612_v55 = vshrl.u32 %v1615_v33, 16  ;;  %v615_v56 = vshll.u32 %v1615_v33, 16  ;;  %v1338_v20 = vld [vmem:[%s1856_s1 + $0x40] sm:$0xff]  }
  0x2e   : > { %896 = vmatprep.subr.bf16.mxu0 %v1409_v0  ;;  %1240 = vmatprep.subr.bf16.mxu1 %v1409_v0  ;;  %v551_v57 = vsel %vm517_vm1, %v542_v41, %v550_v49  ;;  %v470_v58 = vsel %vm452_vm0, %v468_v45, %v469_v50  ;;  %v606_v59 = vrot.slane %v604_v51, 1  ;;  %v1638_v60 = vcombine.low %v207_v39, %v1626_v46  ;;  %v233_v30 = vld [vmem:[%s1501_s9 + $0x48] sm:$0xe] }
  0x2f   : > { %414 = vrot.lane.b32.xlu0 %v339_v48, %s1412_s5  ;;  %v382_v63 = vor.u32 %v381_v53, %v377_v38  ;;  %v609_v1 = vrot.slane %v607_v54, 2  ;;  %v614_v3 = vrot.slane %v612_v55, 1  ;;  %v617_v9 = vrot.slane %v615_v56, 2  ;;  %v209_v48 = vld [vmem:[%s1501_s9 + $0x24] sm:$0xf] }
  0x30   : > { %v341_v12 = vshrl.u32 %v1638_v60, 16  ;;  %v343_v14 = vshll.u32 %v1638_v60, 16  ;;  %v348_v19 = vshll.u32 %v1314_v61, 16  ;;  %v1188_v6 = vcombine.low %v229_v52, %v1626_v46 }
  0x31   : > { %897 = vmatpush1.bf16.msra.mxu0 %v1336_v40  ;;  %1250 = vmatpush1.bf16.msra.mxu1 %v1336_v40  ;;  %v387_v21 = vsel %vm315_vm2, %v382_v63, %v386_v44  ;;  %v610_v22 = vor.u32 %v609_v1, %v606_v59  ;;  %v618_v23 = vor.u32 %v617_v9, %v614_v3  ;;  %v460_v24 = vrot.slane %v1314_v61, 1  ;;  %v1673_v40 = vld [vmem:[%s1501_s9 + $0x50] ss:$0 sps:$4 sm:$0x33]  }
  0x32   : > { %910 = vmatprep.subr.bf16.mxu0 %v1409_v0  ;;  %1241 = vmatprep.subr.bf16.mxu1 %v1409_v0  ;;  %v345_v26 = vrot.slane %v343_v14, 1  ;;  %v350_v18 = vrot.slane %v348_v19, 1  ;;  %v459_v27 = vrot.slane %v1188_v6, 1  ;;  %v553_v28 = vshrl.u32 %v1188_v6, 16 }
  0x33   : > { %656 = vrot.lane.b32.xlu0 %v551_v57, %s1411_s28  ;;  %422 = vrot.lane.b32.xlu1 %v387_v21, %s1412_s5  ;;  %v619_v31 = vsel %vm517_vm1, %v610_v22, %v618_v23  ;;  %v556_v7 = vshll.u32 %v1188_v6, 16  ;;  %v561_v32 = vshrl.u32 %v1645_v10, 16  ;;  %v564_v34 = vshll.u32 %v1645_v10, 16  ;;  %v1322_v57 = vld [vmem:[%s1501_s9 + $0x2c] ss:$0 sps:$4 sm:$0x11]  }
  0x34   : > { %v346_v35 = vor.u32 %v345_v26, %v341_v12  ;;  %v461_v37 = vsel %vm452_vm0, %v459_v27, %v460_v24  ;;  %v555_v38 = vrot.slane %v553_v28, 1  ;;  %v1670_v39 = vcombine.low %v215_v11, %v1653_v15  ;;  %v1696_v12 = vld [vmem:[%s1501_s9 + $0x2c] ss:$0 sps:$4 sm:$0x33]   ;;  %v1704_v26 = vld [vmem:[%s1501_s9 + $0x58] sm:$0xf] }
  0x35   : > { %911 = vmatpush2.bf16.msra.mxu0 %v1337_v62  ;;  %1251 = vmatpush2.bf16.msra.mxu1 %v1337_v62  ;;  %v558_v41 = vrot.slane %v556_v7, 2  ;;  %v563_v43 = vrot.slane %v561_v32, 1  ;;  %v566_v44 = vrot.slane %v564_v34, 2  ;;  %v396_v45 = vshll.u32 %v1318_v25, 16  ;;  %v234_v7 = vld [vmem:[%s1501_s9 + $0x54] sm:$0xe] }
  0x36   : > { %912 = vmatprep.subr.bf16.mxu0 %v1409_v0  ;;  %1242 = vmatprep.subr.bf16.mxu1 %v1409_v0  ;;  %v351_v49 = vsel %vm315_vm2, %v346_v35, %v350_v18  ;;  %v389_v50 = vshrl.u32 %v1670_v39, 16  ;;  %v391_v51 = vshll.u32 %v1670_v39, 16  ;;  %v1192_v52 = vcombine.low %v233_v30, %v1653_v15  ;;  %v1684_v0 = vld [vmem:[%s1501_s9 + $0x28] sm:$0xf] }
  0x37   : > { %487 = vrot.lane.b32.xlu0 %v470_v58, %s1410_s14  ;;  %664 = vrot.lane.b32.xlu1 %v619_v31, %s1411_s28  ;;  %v559_v53 = vor.u32 %v558_v41, %v555_v38  ;;  %v567_v54 = vor.u32 %v566_v44, %v563_v43  ;;  %v398_v55 = vrot.slane %v396_v45, 1  ;;  %v472_v56 = vrot.slane %v1318_v25, 1  ;;  %v230_v58 = vld [vmem:[%s1501_s9 + $0x24] sm:$0xe]  ;;  %v217_v25 = vld [vmem:[%s1501_s9 + $0x54] sm:$0xf] }
  0x38   : > { %v393_v59 = vrot.slane %v391_v51, 1  ;;  %v471_v61 = vrot.slane %v1192_v52, 1  ;;  %v621_v62 = vshrl.u32 %v1192_v52, 16  ;;  %v624_v63 = vshll.u32 %v1192_v52, 16 }
  0x39   : > { %913 = vmatpush2.bf16.msra.mxu0 %v1338_v20  ;;  %1252 = vmatpush2.bf16.msra.mxu1 %v1338_v20  ;;  %v568_v1 = vsel %vm517_vm1, %v559_v53, %v567_v54  ;;  %v629_v3 = vshrl.u32 %v1673_v40, 16  ;;  %v632_v9 = vshll.u32 %v1673_v40, 16  ;;  %v1693_v11 = vcombine.low %v209_v48, %v1684_v0  ;;  %v1326_v31 = vld [vmem:[%s1501_s9 + $0x5c] ss:$0 sps:$4 sm:$0x11]  }
  0x3a   : > { %v394_v14 = vor.u32 %v393_v59, %v389_v50  ;;  %v473_v19 = vsel %vm452_vm0, %v471_v61, %v472_v56  ;;  %v623_v6 = vrot.slane %v621_v62, 1  ;;  %v626_v20 = vrot.slane %v624_v63, 2  ;;  %v1716_v51 = vld [vmem:[%s1501_s9 + $0x5c] ss:$0 sps:$4 sm:$0x33]  }
  0x3b   : > { %416 = vrot.lane.b32.xlu0 %v351_v49, %s1412_s5  ;;  %481 = vrot.lane.b32.xlu1 %v461_v37, %s1410_s14  ;;  %v631_v21 = vrot.slane %v629_v3, 1  ;;  %v634_v22 = vrot.slane %v632_v9, 2  ;;  %v353_v23 = vshrl.u32 %v1693_v11, 16  ;;  %v355_v24 = vshll.u32 %v1693_v11, 16 }
  0x3c   : > { %v399_v18 = vsel %vm315_vm2, %v394_v14, %v398_v55  ;;  %v627_v27 = vor.u32 %v626_v20, %v623_v6  ;;  %v360_v28 = vshll.u32 %v1322_v57, 16  ;;  %v1189_v30 = vcombine.low %v230_v58, %v1684_v0 }
  0x3d   : > { %v635_v32 = vor.u32 %v634_v22, %v631_v21  ;;  %v357_v34 = vrot.slane %v355_v24, 1  ;;  %v463_v35 = vrot.slane %v1322_v57, 1  ;;  %v578_v37 = vshrl.u32 %v1696_v12, 16 }
  0x3e   : > { %v362_v38 = vrot.slane %v360_v28, 1  ;;  %v462_v41 = vrot.slane %v1189_v30, 1  ;;  %v570_v43 = vshrl.u32 %v1189_v30, 16  ;;  %v573_v44 = vshll.u32 %v1189_v30, 16 }
  0x3f   : > { %658 = vrot.lane.b32.xlu0 %v568_v1, %s1411_s28  ;;  %424 = vrot.lane.b32.xlu1 %v399_v18, %s1412_s5  ;;  %v636_v45 = vsel %vm517_vm1, %v627_v27, %v635_v32  ;;  %v358_v48 = vor.u32 %v357_v34, %v353_v23  ;;  %v580_v49 = vrot.slane %v578_v37, 1  ;;  %v581_v50 = vshll.u32 %v1696_v12, 16  ;;  %v243_v23 = vld [vmem:[%s1501_s9] sm:$0xc]  ;;  %v247_v27 = vld [vmem:[%s1501_s9 + $0x30] sm:$0xc] }
  0x40   : > { %v464_v52 = vsel %vm452_vm0, %v462_v41, %v463_v35  ;;  %v572_v53 = vrot.slane %v570_v43, 1  ;;  %v575_v54 = vrot.slane %v573_v44, 2  ;;  %v1720_v55 = vcombine.low %v217_v25, %v1704_v26  ;;  %v244_v32 = vld [vmem:[%s1501_s9 + $0xc] sm:$0xc]  ;;  %v248_v37 = vld [vmem:[%s1501_s9 + $0x3c] sm:$0xc] }
  0x41   : > { %v363_v56 = vsel %vm315_vm2, %v358_v48, %v362_v38  ;;  %v583_v57 = vrot.slane %v581_v50, 2  ;;  %v408_v58 = vshll.u32 %v1326_v31, 16  ;;  %v1193_v59 = vcombine.low %v234_v7, %v1704_v26  ;;  %v245_v44 = vld [vmem:[%s1501_s9 + $0x18] sm:$0xc] }
  0x42   : > { %v576_v61 = vor.u32 %v575_v54, %v572_v53  ;;  %v401_v62 = vshrl.u32 %v1720_v55, 16  ;;  %v403_v63 = vshll.u32 %v1720_v55, 16  ;;  %v475_v1 = vrot.slane %v1326_v31, 1 }
  0x43   : > { %489 = vrot.lane.b32.xlu0 %v473_v19, %s1410_s14  ;;  %666 = vrot.lane.b32.xlu1 %v636_v45, %s1411_s28  ;;  %v584_v3 = vor.u32 %v583_v57, %v580_v49  ;;  %v410_v9 = vrot.slane %v408_v58, 1  ;;  %v474_v14 = vrot.slane %v1193_v59, 1  ;;  %v638_v19 = vshrl.u32 %v1193_v59, 16 }
  0x44   : > { %v405_v6 = vrot.slane %v403_v63, 1  ;;  %v641_v20 = vshll.u32 %v1193_v59, 16  ;;  %v646_v21 = vshrl.u32 %v1716_v51, 16  ;;  %v649_v22 = vshll.u32 %v1716_v51, 16  ;;  %v250_v59 = vld [vmem:[%s1501_s9 + $0x54] sm:$0xc] }
  0x45   : > { %v585_v24 = vsel %vm517_vm1, %v576_v61, %v584_v3  ;;  %v640_v25 = vrot.slane %v638_v19, 1  ;;  %v1202_v18 = vcombine.low %v243_v23, %v1517_v8  ;;  %v696_v35 = vrot.slane %v1531_v16, 2  ;;  %v249_v16 = vld [vmem:[%s1501_s9 + $0x48] sm:$0xc] }
  0x46   : > { %v406_v28 = vor.u32 %v405_v6, %v401_v62  ;;  %v643_v30 = vrot.slane %v641_v20, 2  ;;  %v648_v31 = vrot.slane %v646_v21, 1  ;;  %v651_v7 = vrot.slane %v649_v22, 2 }
  0x47   : > { %418 = vrot.lane.b32.xlu0 %v363_v56, %s1412_s5  ;;  %483 = vrot.lane.b32.xlu1 %v464_v52, %s1410_s14  ;;  %v695_v34 = vrot.slane %v1202_v18, 2  ;;  %v476_v8 = vsel %vm452_vm0, %v474_v14, %v475_v1  ;;  %v1206_v48 = vcombine.low %v247_v27, %v1534_v17  ;;  %v708_v49 = vrot.slane %v1563_v47, 2  ;;  %v246_v52 = vld [vmem:[%s1501_s9 + $0x24] sm:$0xc]  ;;  %s1351_s9 = sshll.u32 %s1413_s12, 4  ;;  %s1352_s9 = int_to_ptr.vmem [resolvable:$false] %s1351_s9 }
  0x48   : > { %v411_v38 = vsel %vm315_vm2, %v406_v28, %v410_v9  ;;  %v644_v41 = vor.u32 %v643_v30, %v640_v25  ;;  %v652_v43 = vor.u32 %v651_v7, %v648_v31  ;;  %v1203_v50 = vcombine.low %v244_v32, %v1507_v4  ;;  %s1353_s19 = scalar_lea.vmem %s1352_s9, 256 }
  0x49   : > { %v697_v45 = vsel %vm694_vm4, %v695_v34, %v696_v35  ;;  %v699_v54 = vrot.slane %v1585_v5, 2  ;;  %v1207_v56 = vcombine.low %v248_v37, %v1590_v13  ;;  %v711_v57 = vrot.slane %v1615_v33, 2 }
  0x4a   : > { %v653_v53 = vsel %vm517_vm1, %v644_v41, %v652_v43  ;;  %1220 = vmatprep.mubr.msk.bf16.mxu0 %vm719_vm3, %v697_v45  ;;  %v707_v58 = vrot.slane %v1206_v48, 2  ;;  %v698_v17 = vrot.slane %v1203_v50, 2  ;;  %v1204_v47 = vcombine.low %v245_v44, %v1626_v46 }
  0x4b   : > { %660 = vrot.lane.b32.xlu0 %v585_v24, %s1411_s28  ;;  %426 = vrot.lane.b32.xlu1 %v411_v38, %s1412_s5  ;;  %v702_v4 = vrot.slane %v1645_v10, 2  ;;  %v710_v61 = vrot.slane %v1207_v56, 2  ;;  %v1208_v62 = vcombine.low %v249_v16, %v1653_v15  ;;  %v714_v63 = vrot.slane %v1673_v40, 2  ;;  %s1104_s5 = sshll.u32 %s193_s30, 4  ;;  %s1105_s5 = int_to_ptr.vmem [resolvable:$true] %s1104_s5 }
  0x4c   : > { %v1205_v1 = vcombine.low %v246_v52, %v1684_v0  ;;  %v709_v5 = vsel %vm694_vm4, %v707_v58, %v708_v49  ;;  %v700_v13 = vsel %vm694_vm4, %v698_v17, %v699_v54  ;;  %v701_v33 = vrot.slane %v1204_v47, 2  ;;  %s1347_s11 = scalar_lea.vmem %s1105_s5, 128  ;;  %p1354_p0 = scmp.lt.s32.totalorder %s1105_s5, %s1352_s9 }
  0x4d   : > { %v705_v3 = vrot.slane %v1696_v12, 2  ;;  %1224 = vmatprep.mubr.msk.bf16.mxu1 %vm719_vm3, %v709_v5  ;;  %v712_v46 = vsel %vm694_vm4, %v710_v61, %v711_v57  ;;  %v713_v10 = vrot.slane %v1208_v62, 2  ;;  %v1209_v40 = vcombine.low %v250_v59, %v1704_v26  ;;  %p1348_p11 = scmp.ne.s32.totalorder %s1105_s5, %s1347_s11  ;;  %p1355_p1 = scmp.lt.s32.totalorder %s1353_s19, %s1347_s11 }
  0x4e   : > { %v704_v15 = vrot.slane %v1205_v1, 2  ;;  %v703_v0 = vsel %vm694_vm4, %v701_v33, %v702_v4  ;;  %v717_v9 = vrot.slane %v1716_v51, 2  ;;  %vm1074_vm13 = vcmask 1047559  }
  0x4f   : > { %491 = vrot.lane.b32.xlu0 %v476_v8, %s1410_s14  ;;  %668 = vrot.lane.b32.xlu1 %v653_v53, %s1411_s28  ;;  %v715_v14 = vsel %vm694_vm4, %v713_v10, %v714_v63  ;;  %v716_v6 = vrot.slane %v1209_v40, 2  ;;  %p1349_p12 = pnand %p1348_p11, %p1477_p5  ;;  %p1356_p2 = por %p1355_p1, %p1354_p0 }
  0x50   : > { %v706_v19 = vsel %vm694_vm4, %v704_v15, %v705_v3 }
  0x51   : > { %v718_v12 = vsel %vm694_vm4, %v716_v6, %v717_v9  ;;  %p1350_p13 = pneg %p1349_p12 }
  0x53   : > { %p1357_p3 = pnand %p1356_p2, %p1350_p13 }
  0x91   : > { %v480_v20 = vpop.permute.xlu1 %479  ;;  %v478_v21 = vpop.permute.xlu0 %477 }
  0x95   : > { %v486_v22 = vpop.permute.xlu0 %485  ;;  %v655_v23 = vpop.permute.xlu1 %654 }
  0x99   : > { %v421_v24 = vpop.permute.xlu1 %420 }
  0x9a   : > { %v729_v26 = vsel %vm719_vm3, %v1550_v36, %v421_v24  ;;  %v413_v25 = vpop.permute.xlu0 %412 }
  0x9b   : > { %v721_v51 = vsel %vm719_vm3, %v1557_v42, %v413_v25  ;;  %v746_v30 = vsel %vm736_vm5, %v729_v26, %v486_v22  ;;  %v979_v22 = vld [vmem:[%s1857_s2] sm:$0xff] }
  0x9c   : > { %v738_v18 = vsel %vm736_vm5, %v721_v51, %v478_v21 }
  0x9d   : > { %v663_v27 = vpop.permute.xlu1 %662  ;;  %v755_v28 = vsel %vm753_vm6, %v738_v18, %v655_v23 }
  0x9e   : > { %915 = vmatmul.mubr.bf16.vlgmr.msra.gmra.mxu0 %v755_v28  ;;  %v767_v31 = vsel %vm753_vm6, %v746_v30, %v663_v27 }
  0x9f   : > { %947 = vmatmul.mubr.bf16.vlgmr.msra.gmra.mxu1 %v767_v31  ;;  %1221 = vmatprep.mubr.msk.bf16.mxu0 %vm719_vm3, %v700_v13 }
  0xa0   : > { %1225 = vmatprep.mubr.msk.bf16.mxu1 %vm719_vm3, %v712_v46 }
  0xa1   : > { %v415_v7 = vpop.permute.xlu0 %414 }
  0xa2   : > { %v723_v36 = vsel %vm719_vm3, %v1580_v2, %v415_v7 }
  0xa3   : > { %v740_v34 = vsel %vm736_vm5, %v723_v36, %v480_v20 }
  0xa5   : > { %v657_v42 = vpop.permute.xlu0 %656  ;;  %v423_v32 = vpop.permute.xlu1 %422 }
  0xa6   : > { %v758_v35 = vsel %vm753_vm6, %v740_v34, %v657_v42  ;;  %v731_v37 = vsel %vm719_vm3, %v1609_v29, %v423_v32 }
  0xa7   : > { %923 = vmatmul.mubr.bf16.gmra.mxu0 %v758_v35 }
  0xa8   : > { %1222 = vmatprep.mubr.msk.bf16.mxu0 %vm719_vm3, %v703_v0 }
  0xa9   : > { %v488_v38 = vpop.permute.xlu0 %487  ;;  %v665_v41 = vpop.permute.xlu1 %664 }
  0xaa   : > { %v748_v8 = vsel %vm736_vm5, %v731_v37, %v488_v38 }
  0xab   : > { %v770_v43 = vsel %vm753_vm6, %v748_v8, %v665_v41 }
  0xac   : > { %955 = vmatmul.mubr.bf16.gmra.mxu1 %v770_v43 }
  0xad   : > { %v417_v2 = vpop.permute.xlu0 %416  ;;  %1226 = vmatprep.mubr.msk.bf16.mxu1 %vm719_vm3, %v715_v14  ;;  %v482_v45 = vpop.permute.xlu1 %481 }
  0xae   : > { %v725_v44 = vsel %vm719_vm3, %v1638_v60, %v417_v2 }
  0xaf   : > { %v742_v48 = vsel %vm736_vm5, %v725_v44, %v482_v45 }
  0xb1   : > { %v659_v49 = vpop.permute.xlu0 %658  ;;  %v425_v29 = vpop.permute.xlu1 %424 }
  0xb2   : > { %v761_v50 = vsel %vm753_vm6, %v742_v48, %v659_v49  ;;  %v733_v16 = vsel %vm719_vm3, %v1670_v39, %v425_v29 }
  0xb3   : > { %931 = vmatmul.mubr.bf16.gmra.mxu0 %v761_v50 }
  0xb4   : > { %1223 = vmatprep.mubr.msk.bf16.mxu0 %vm719_vm3, %v706_v19 }
  0xb5   : > { %v490_v52 = vpop.permute.xlu0 %489  ;;  %v667_v54 = vpop.permute.xlu1 %666 }
  0xb6   : > { %v750_v53 = vsel %vm736_vm5, %v733_v16, %v490_v52 }
  0xb7   : > { %v773_v56 = vsel %vm753_vm6, %v750_v53, %v667_v54 }
  0xb8   : > { %963 = vmatmul.mubr.bf16.gmra.mxu1 %v773_v56 }
  0xb9   : > { %v419_v60 = vpop.permute.xlu0 %418  ;;  %1227 = vmatprep.mubr.msk.bf16.mxu1 %vm719_vm3, %v718_v12  ;;  %v484_v58 = vpop.permute.xlu1 %483  ;;  %v980_v12 = vld [vmem:[%s1857_s2 + $0x8] sm:$0xff] }
  0xba   : > { %v727_v57 = vsel %vm719_vm3, %v1693_v11, %v419_v60 }
  0xbb   : > { %v744_v17 = vsel %vm736_vm5, %v727_v57, %v484_v58 }
  0xbd   : > { %v661_v47 = vpop.permute.xlu0 %660  ;;  %v427_v4 = vpop.permute.xlu1 %426 }
  0xbe   : > { %v764_v39 = vsel %vm753_vm6, %v744_v17, %v661_v47  ;;  %v735_v59 = vsel %vm719_vm3, %v1720_v55, %v427_v4 }
  0xbf   : > { %939 = vmatmul.mubr.bf16.gmra.mxu0 %v764_v39 }
  0xc1   : > { %v492_v61 = vpop.permute.xlu0 %491  ;;  %v669_v63 = vpop.permute.xlu1 %668 }
  0xc2   : > { %v752_v62 = vsel %vm736_vm5, %v735_v59, %v492_v61 }
  0xc3   : > { %v776_v1 = vsel %vm753_vm6, %v752_v62, %v669_v63 }
  0xc4   : > { %971 = vmatmul.mubr.bf16.gmra.mxu1 %v776_v1 }
 0x15e   : > { %v916_v5 = vpop.f32.mrf.mxu0 }
 0x15f   : > { %v948_v11 = vpop.f32.mrf.mxu1  ;;  %v981_v51 = vadd.f32 %v979_v22, %v916_v5 }
 0x160   : > { %v918_v13 = vpop.f32.mrf.mxu0  ;;  %v989_v32 = vadd.f32 %v979_v22, %v948_v11 }
 0x161   : > { %v950_v33 = vpop.f32.mrf.mxu1 }
 0x162   : > { %v919_v3 = vpop.f32.mrf.mxu0 }
 0x163   : > { %v951_v46 = vpop.f32.mrf.mxu1  ;;  %v982_v24 = vadd.f32 %v980_v12, %v919_v3 }
 0x164   : > { %v921_v10 = vpop.f32.mrf.mxu0  ;;  %v990_v27 = vadd.f32 %v980_v12, %v951_v46 }
 0x165   : > { %v953_v15 = vpop.f32.mrf.mxu1  ;;  %v998_v30 = vmax.f32 %v981_v51, %v982_v24 }
 0x166   : > { %v1026_v41 = vmax.f32 %v989_v32, %v990_v27 }
 0x167   : > { %v924_v40 = vpop.f32.mrf.mxu0  ;;  %v999_v43 = vrot.slane %v998_v30, 4 }
 0x168   : > { %v983_v26 = vadd.f32 %v979_v22, %v924_v40  ;;  %v1027_v16 = vrot.slane %v1026_v41, 4 }
 0x169   : > { %v926_v0 = vpop.f32.mrf.mxu0  ;;  %v1000_v56 = vmax.f32 %v998_v30, %v999_v43 }
 0x16a   : > { %v1028_v47 = vmax.f32 %v1026_v41, %v1027_v16 }
 0x16b   : > { %v927_v14 = vpop.f32.mrf.mxu0  ;;  %v1001_v59 = vrot.slane %v1000_v56, 2 }
 0x16c   : > { %v956_v9 = vpop.f32.mrf.mxu1  ;;  %v984_v20 = vadd.f32 %v980_v12, %v927_v14  ;;  %v1029_v46 = vrot.slane %v1028_v47, 2 }
 0x16d   : > { %v929_v19 = vpop.f32.mrf.mxu0  ;;  %v991_v35 = vadd.f32 %v979_v22, %v956_v9  ;;  %v1002_v15 = vmax.f32 %v1000_v56, %v1001_v59 }
 0x16e   : > { %v958_v55 = vpop.f32.mrf.mxu1  ;;  %v1005_v18 = vmax.f32 %v983_v26, %v984_v20 }
 0x170   : > { %v959_v6 = vpop.f32.mrf.mxu1  ;;  %v1006_v37 = vrot.slane %v1005_v18, 4 }
 0x171   : > { %v992_v31 = vadd.f32 %v980_v12, %v959_v6 }
 0x172   : > { %v961_v21 = vpop.f32.mrf.mxu1  ;;  %v1007_v29 = vmax.f32 %v1005_v18, %v1006_v37 }
 0x173   : > { %v932_v23 = vpop.f32.mrf.mxu0  ;;  %v1033_v2 = vmax.f32 %v991_v35, %v992_v31 }
 0x174   : > { %v985_v7 = vadd.f32 %v979_v22, %v932_v23  ;;  %v1008_v17 = vrot.slane %v1007_v29, 2  ;;  %v1030_v23 = vmax.f32 %v1028_v47, %v1029_v46 }
 0x175   : > { %v934_v25 = vpop.f32.mrf.mxu0  ;;  %v1034_v60 = vrot.slane %v1033_v2, 4 }
 0x176   : > { %v1009_v13 = vmax.f32 %v1007_v29, %v1008_v17  ;;  %v1003_v25 = vrot.slane %v1002_v15, 1 }
 0x177   : > { %v935_v28 = vpop.f32.mrf.mxu0  ;;  %v1035_v61 = vmax.f32 %v1033_v2, %v1034_v60 }
 0x178   : > { %v986_v36 = vadd.f32 %v980_v12, %v935_v28  ;;  %v964_v42 = vpop.f32.mrf.mxu1  ;;  %v1010_v6 = vrot.slane %v1009_v13, 1 }
 0x179   : > { %v937_v34 = vpop.f32.mrf.mxu0  ;;  %v993_v48 = vadd.f32 %v979_v22, %v964_v42  ;;  %v1036_v40 = vrot.slane %v1035_v61, 2 }
 0x17a   : > { %v1012_v38 = vmax.f32 %v985_v7, %v986_v36  ;;  %v966_v8 = vpop.f32.mrf.mxu1  ;;  %v1011_v30 = vmax.f32 %v1009_v13, %v1010_v6  ;;  %v1031_v7 = vrot.slane %v1030_v23, 1 }
 0x17b   : > { %v1037_v51 = vmax.f32 %v1035_v61, %v1036_v40 }
 0x17c   : > { %v1013_v44 = vrot.slane %v1012_v38, 4  ;;  %v967_v45 = vpop.f32.mrf.mxu1  ;;  %v1032_v8 = vmax.f32 %v1030_v23, %v1031_v7 }
 0x17d   : > { %v994_v49 = vadd.f32 %v980_v12, %v967_v45 }
 0x17e   : > { %v969_v50 = vpop.f32.mrf.mxu1  ;;  %v1014_v52 = vmax.f32 %v1012_v38, %v1013_v44 }
 0x17f   : > { %v1040_v53 = vmax.f32 %v993_v48, %v994_v49  ;;  %v940_v54 = vpop.f32.mrf.mxu0 }
 0x180   : > { %v1015_v4 = vrot.slane %v1014_v52, 2  ;;  %v987_v62 = vadd.f32 %v979_v22, %v940_v54 }
 0x181   : > { %v1041_v57 = vrot.slane %v1040_v53, 4  ;;  %v942_v58 = vpop.f32.mrf.mxu0 }
 0x182   : > { %v1016_v10 = vmax.f32 %v1014_v52, %v1015_v4 }
 0x183   : > { %v943_v39 = vpop.f32.mrf.mxu0  ;;  %v1042_v5 = vmax.f32 %v1040_v53, %v1041_v57  ;;  %v1228_v53 = vld [vmem:[%s1858_s3] ss:$0 sm:$0xff] }
 0x184   : > { %v988_v63 = vadd.f32 %v980_v12, %v943_v39  ;;  %v972_v1 = vpop.f32.mrf.mxu1  ;;  %v1017_v24 = vrot.slane %v1016_v10, 1 }
 0x185   : > { %v945_v11 = vpop.f32.mrf.mxu0  ;;  %v1043_v14 = vrot.slane %v1042_v5, 2  ;;  %v995_v55 = vadd.f32 %v979_v22, %v972_v1  ;;  %v1004_v22 = vmax.f32 %v1002_v15, %v1003_v25 }
 0x186   : > { %v1019_v33 = vmax.f32 %v987_v62, %v988_v63  ;;  %v974_v3 = vpop.f32.mrf.mxu1  ;;  %v1018_v36 = vmax.f32 %v1016_v10, %v1017_v24 }
 0x187   : > { %v1044_v27 = vmax.f32 %v1042_v5, %v1043_v14  ;;  %v1063_v37 = vsel %vm1062_vm7, %v1011_v30, %v1004_v22 }
 0x188   : > { %v1020_v0 = vrot.slane %v1019_v33, 4  ;;  %v975_v9 = vpop.f32.mrf.mxu1  ;;  %v1065_v41 = vsel %vm1064_vm8, %v1018_v36, %v1063_v37 }
 0x189   : > { %v996_v19 = vadd.f32 %v980_v12, %v975_v9  ;;  %v1038_v12 = vrot.slane %v1037_v51, 1  ;;  %v1045_v34 = vrot.slane %v1044_v27, 1 }
 0x18a   : > { %v1021_v20 = vmax.f32 %v1019_v33, %v1020_v0  ;;  %v977_v21 = vpop.f32.mrf.mxu1 }
 0x18b   : > { %v1047_v26 = vmax.f32 %v995_v55, %v996_v19  ;;  %v1039_v2 = vmax.f32 %v1037_v51, %v1038_v12  ;;  %v1046_v45 = vmax.f32 %v1044_v27, %v1045_v34 }
 0x18c   : > { %v1022_v18 = vrot.slane %v1021_v20, 2 }
 0x18d   : > { %v1048_v28 = vrot.slane %v1047_v26, 4 }
 0x18e   : > { %v1023_v31 = vmax.f32 %v1021_v20, %v1022_v18 }
 0x18f   : > { %v1049_v42 = vmax.f32 %v1047_v26, %v1048_v28 }
 0x190   : > { %v1024_v32 = vrot.slane %v1023_v31, 1 }
 0x191   : > { %v1050_v35 = vrot.slane %v1049_v42, 2 }
 0x192   : > { %v1025_v38 = vmax.f32 %v1023_v31, %v1024_v32 }
 0x193   : > { %v1051_v43 = vmax.f32 %v1049_v42, %v1050_v35 }
 0x194   : > { %v1067_v44 = vsel %vm1066_vm9, %v1025_v38, %v1065_v41 }
 0x195   : > { %v1052_v48 = vrot.slane %v1051_v43, 1  ;;  %v1069_v49 = vsel %vm1068_vm10, %v1032_v8, %v1067_v44 }
 0x196   : > { %v1071_v29 = vsel %vm1070_vm11, %v1039_v2, %v1069_v49 }
 0x197   : > { %v1053_v50 = vmax.f32 %v1051_v43, %v1052_v48  ;;  %v1073_v16 = vsel %vm1072_vm12, %v1046_v45, %v1071_v29 }
 0x199   : > { %v1075_v52 = vsel %vm1074_vm13, %v1053_v50, %v1073_v16 }
 0x19a   : > { %v1077_v54 = vmax.f32 %v1075_v52, -1e+30 }
 0x19c   : > { %v1087_v56 = vadd.f32 %v1228_v53, %v1077_v54 }
 0x19e   : > { %v1088_v60 = vmax.f32 %v1087_v56, 0.0 }
 0x1a0   : > { %1089 = vst [vmem:[%s193_s30] sm:$0xff] %v1088_v60 }
 0x1a1   : > { %1360 = shalt.err (!%p1357_p3)
}
 0x1a2   : > { %s1361_s13 = scalar_lea.hbm %s1102_s8, 128  ;;  %s1365_s22 = scalar_lea.hbm %s1859_s4, 256 }
 0x1a3   : > { %p1362_p4 = scmp.ne.s32.totalorder %s1102_s8, %s1361_s13  ;;  %p1366_p9 = scmp.lt.s32.totalorder %s1102_s8, %s1859_s4 }
 0x1a4   : > { %p1367_p10 = scmp.lt.s32.totalorder %s1365_s22, %s1361_s13 }
 0x1a5   : > { %p1363_p7 = pnand %p1362_p4, %p1477_p5 }
 0x1a6   : > { %p1368_p11 = por %p1367_p10, %p1366_p9 }
 0x1a7   : > { %p1364_p8 = pneg %p1363_p7 }
 0x1a9   : > { %p1369_p12 = pnand %p1368_p11, %p1364_p8 }
 0x1ab   : > { %1372 = shalt.err (!%p1369_p12)
}
 0x1ac   : > { %1254 = dma.vmem_to_hbm [thread:$0]  (%p1477_p5), %s1105_s5, 128, %s1102_s8, %s1091_s10  }
 0x1ad PF: > { %p1260_p13 = scmp.ge.s32.totalorder %s1407_s18, 2  ;;  %s1116_s28 = sand.u32 1, %s1395_s15  }
 0x1ae   : > { %s1117_s29 = scalar_lea.sflag [#allocation4], %s1116_s28 }
 0x1af   : > { %p1257_p0 = pnand %p1260_p13, %p1481_p6 }
 0x1b1   : > { %p1258_p1 = pneg %p1257_p0 }
 0x1b3   : > { %1390 = dma.done.wait (%p1258_p1), %s1117_s29, 128  }
 0x1b4   : > { %1392 = vsyncadd (%p1258_p1), %s1117_s29, 4294967168  ;;  %p14_p2 = scmp.ge.s32.totalorder %s1464_s21, 4   ;;  %s1862_s15 = smov %s1399_s16 }
 0x1b5   : > { %s1863_s16 = smov %s1403_s17  ;;  %s1864_s17 = smov %s1475_s24 }
 0x1b6   : > { %s1865_s18 = smov %s1464_s21  ;;  %16 = sbr.rel (!%p14_p2) target bundleno = 3 (0x3), region = 71 }
 0x1bb   :  { %1122 = vsyncpa [#allocation4], 1 }
 0x1bc   :  { %1124 = vsyncpa [#allocation4 + $0x1], 1 }

</bundles_post_ra>
